<compile_context>
chip_gen: v6e
topology: v6e:2x2x1
jax: 0.10.0
libtpu: 0.0.40
codegen_flags: <defaults>
</compile_context>

<pallas_src>
import functools

import jax
import jax.numpy as jnp
from jax.experimental import pallas as pl
from jax.experimental.pallas import tpu as pltpu


def _round_up(x, m):
    return (x + m - 1) // m * m


def _vmem_capacity_bytes():
    try:
        return int(pltpu.get_tpu_info().vmem_capacity_bytes)
    except Exception:
        return 64 * 1024 * 1024  # safe floor: v7x physical VMEM


# ----------------------------------------------------------------------------
# cal_criterion (init-time glue, "with cache" branch; no file caching).
# TODO(synk): the torch.save/torch.load disk-cache branch has no in-kernel
# equivalent and is omitted; the criterion/top-k itself is init-time glue.
# ----------------------------------------------------------------------------
def cal_criterion_jax(clip_weights, cache_keys, shots_total, w, k):
    feat_dim, cate_num = clip_weights.shape
    text_feat = clip_weights.T[:, None, :]                         # [cate, 1, feat]
    cache_feat = cache_keys.reshape(cate_num, shots_total, feat_dim)
    feats = jnp.concatenate([text_feat, cache_feat], axis=1)       # [cate, samp, feat]
    samp_num = feats.shape[1]
    sum_feats = feats.sum(axis=1)                                  # [cate, feat]
    total_sum = sum_feats.sum(axis=0) ** 2                         # [feat]
    diag_sum = (sum_feats ** 2).sum(axis=0)                        # [feat]
    sim = (total_sum - diag_sum) / (cate_num * (cate_num - 1) * samp_num ** 2)
    # torch.var defaults to unbiased (ddof=1)
    criterion = -1.0 * w[0] * sim + w[1] * jnp.var(clip_weights, axis=1, ddof=1)
    _, indices = jax.lax.top_k(criterion, k)
    return indices


# ----------------------------------------------------------------------------
# Pallas kernels.
# ----------------------------------------------------------------------------
def _gda_kernel(keys_ref, upd_ref, vals_ref, vw_ref, nk_ref, nv_ref):
    # new_cache_keys: (cats, shots, feat) + (cats, 1, feat)   -- sublane bcast
    nk_ref[...] = keys_ref[...] + upd_ref[...]
    # new_cache_values: (cats, shots, cate) * (cats, shots, 1) -- lane bcast
    nv_ref[...] = vals_ref[...] * vw_ref[...]


def _clip_kernel(cw_ref, updt_ref, ncw_ref):
    # new_clip_weights = clip_weights + upd.T   (tiny, elementwise)
    ncw_ref[...] = cw_ref[...] + updt_ref[...]


# ----------------------------------------------------------------------------
# Wrapper (glue in plain JAX: hoisted scatter, free reshapes, tile sizing).
# ----------------------------------------------------------------------------
@functools.partial(jax.jit, static_argnames=("shots_total",))
def gda_forward(cache_keys, clip_weights, cache_values, res, value_weights,
                indices, *, shots_total):
    compute_dtype = cache_keys.dtype          # keep caller I/O dtype (bf16 rec.)
    clip_weights = clip_weights.astype(compute_dtype)
    cache_values = cache_values.astype(compute_dtype)
    res = res.astype(compute_dtype)
    value_weights = value_weights.astype(compute_dtype)

    N, feat_dim = cache_keys.shape
    _, cate_num = clip_weights.shape
    assert N == cate_num * shots_total, "cache_keys rows must be cate_num*shots"
    isz = jnp.dtype(compute_dtype).itemsize
    sub = max(8, 32 // isz)                   # sublane tile: 8 f32, 16 bf16

    # Hoisted column scatter (top-k indices are unique), runs once in XLA:
    #   upd[c, indices[j]] = res[c, j]
    upd = jnp.zeros((cate_num, feat_dim), compute_dtype).at[:, indices].set(res)
    upd_t = upd.T                                                  # [feat, cate]

    # Category-major 3-D views (free reshapes): every row of a category shares
    # one upd row, so the kernel add is a pure broadcast (no repeat / matmul).
    keys3 = cache_keys.reshape(cate_num, shots_total, feat_dim)
    upd3 = upd.reshape(cate_num, 1, feat_dim)
    vals3 = cache_values.reshape(cate_num, shots_total, cate_num)
    vw3 = value_weights.reshape(cate_num, shots_total, 1)

    # --- generation-aware tile sizing (VMEM footprint uses rounded shapes) ---
    vmem_cap = _vmem_capacity_bytes()
    shots_pad = _round_up(shots_total, sub)
    feat_pad = _round_up(feat_dim, 128)
    cate_lpad = _round_up(cate_num, 128)
    per_cat = (2 * shots_pad * feat_pad        # keys in + out
               + 2 * shots_pad * cate_lpad     # vals in + out
               + shots_pad * 128               # value_weights (lane-dim 1)
               + sub * feat_pad) * isz         # upd row (sublane-dim 1)
    budget = int(vmem_cap * 0.6)
    cats = int(max(1, min(cate_num, budget // (2 * per_cat))))
    grid = (int(pl.cdiv(cate_num, cats)),)
    vmem_limit = int(min(int(vmem_cap * 0.9),
                         max(16 << 20, 2 * cats * per_cat + (2 << 20))))

    flops = N * feat_dim + N * cate_num
    bytes_accessed = (2 * N * feat_dim + 2 * N * cate_num + N
                      + cate_num * feat_dim) * isz

    nk3, nv3 = pl.pallas_call(
        _gda_kernel,
        out_shape=(
            jax.ShapeDtypeStruct((cate_num, shots_total, feat_dim), compute_dtype),
            jax.ShapeDtypeStruct((cate_num, shots_total, cate_num), compute_dtype),
        ),
        grid_spec=pltpu.PrefetchScalarGridSpec(
            num_scalar_prefetch=0,
            grid=grid,
            in_specs=[
                pl.BlockSpec((cats, shots_total, feat_dim), lambda i: (i, 0, 0)),
                pl.BlockSpec((cats, 1, feat_dim), lambda i: (i, 0, 0)),
                pl.BlockSpec((cats, shots_total, cate_num), lambda i: (i, 0, 0)),
                pl.BlockSpec((cats, shots_total, 1), lambda i: (i, 0, 0)),
            ],
            out_specs=[
                pl.BlockSpec((cats, shots_total, feat_dim), lambda i: (i, 0, 0)),
                pl.BlockSpec((cats, shots_total, cate_num), lambda i: (i, 0, 0)),
            ]),
        compiler_params=pltpu.CompilerParams(
            # Pure element-wise over disjoint category tiles -> parallel axis
            # (shards across both TensorCores on v7x).
            dimension_semantics=("parallel",),
            vmem_limit_bytes=vmem_limit),
        cost_estimate=pl.CostEstimate(flops=int(flops), transcendentals=0,
                                      bytes_accessed=int(bytes_accessed)),
    )(keys3, upd3, vals3, vw3)

    # --- small, separate clip-weights kernel (no grid-invariant VMEM tax) ----
    clip_budget = 8 * 1024 * 1024
    rt = min(feat_dim,
             max(sub, (clip_budget // (6 * cate_lpad * isz)) // sub * sub))
    if rt >= feat_dim:
        rt = feat_dim                          # full extent: any size is legal
    clip_grid = (int(pl.cdiv(feat_dim, rt)),)
    clip_vmem = int(min(int(vmem_cap * 0.9),
                        max(16 << 20,
                            6 * _round_up(rt, sub) * cate_lpad * isz + (2 << 20))))

    new_clip = pl.pallas_call(
        _clip_kernel,
        out_shape=jax.ShapeDtypeStruct((feat_dim, cate_num), compute_dtype),
        grid_spec=pltpu.PrefetchScalarGridSpec(
            num_scalar_prefetch=0,
            grid=clip_grid,
            in_specs=[pl.BlockSpec((rt, cate_num), lambda i: (i, 0)),
                      pl.BlockSpec((rt, cate_num), lambda i: (i, 0))],
            out_specs=pl.BlockSpec((rt, cate_num), lambda i: (i, 0))),
        compiler_params=pltpu.CompilerParams(
            dimension_semantics=("parallel",),
            vmem_limit_bytes=clip_vmem),
        cost_estimate=pl.CostEstimate(flops=int(feat_dim * cate_num),
                                      transcendentals=0,
                                      bytes_accessed=int(3 * feat_dim * cate_num * isz)),
    )(clip_weights, upd_t)

    new_keys = nk3.reshape(N, feat_dim)
    new_values = nv3.reshape(N, cate_num)
    return new_keys, new_clip, new_values


# ----------------------------------------------------------------------------
# Pure-JAX reference of the PyTorch forward (verification only).
# ----------------------------------------------------------------------------
def gda_forward_ref(cache_keys, clip_weights, cache_values, res, value_weights,
                    indices, shots_total):
    res_keys = jnp.repeat(res, shots_total, axis=0)
    nk = cache_keys.at[:, indices].set(cache_keys[:, indices] + res_keys)
    ncw = clip_weights.at[indices, :].set(clip_weights[indices, :] + res.T)
    ncv = cache_values * value_weights
    return nk, ncw, ncv


if __name__ == "__main__":
    # Small config consistent with the module.
    cfg = dict(shots=2, augment_epoch=2, w=(1.0, 1.0), training_feat_num=8)
    cate_num = 4
    feat_dim = 32
    shots_total = cfg["shots"] * cfg["augment_epoch"]        # 4
    N = cate_num * shots_total                               # 16
    feat_num = cfg["training_feat_num"]                      # 8

    # bf16 I/O (module keeps fp16 params; bf16 is the TPU-native narrow float).
    io_dtype = jnp.bfloat16
    key = jax.random.PRNGKey(0)
    k1, k2, k3, k4 = jax.random.split(key, 4)
    clip_weights = jax.random.normal(k1, (feat_dim, cate_num), jnp.float32).astype(io_dtype)
    cache_keys = jax.random.normal(k2, (N, feat_dim), jnp.float32).astype(io_dtype)
    cache_values = jax.nn.one_hot(jnp.repeat(jnp.arange(cate_num), shots_total),
                                  cate_num, dtype=io_dtype)       # [N, cate_num]

    # Parameters (module __init__ uses ones/zeros; small deterministic random
    # values here so the scatter / multiply paths are actually exercised).
    value_weights = (1.0 + 0.1 * jax.random.normal(k3, (N, 1), jnp.float32)).astype(io_dtype)
    res = (0.1 * jax.random.normal(k4, (cate_num, feat_num), jnp.float32)).astype(io_dtype)

    # indices = cal_criterion(...)  (glue, computed once at init)
    indices = cal_criterion_jax(clip_weights.astype(jnp.float32),
                                cache_keys.astype(jnp.float32),
                                shots_total, cfg["w"], cfg["training_feat_num"])

    out = gda_forward(cache_keys, clip_weights, cache_values, res,
                      value_weights, indices, shots_total=shots_total)
    out = jax.block_until_ready(out)

    ref = gda_forward_ref(cache_keys.astype(jnp.float32),
                          clip_weights.astype(jnp.float32),
                          cache_values.astype(jnp.float32),
                          res.astype(jnp.float32),
                          value_weights.astype(jnp.float32),
                          indices, shots_total)
    for o, r in zip(out, ref):
        assert o.shape == r.shape, (o.shape, r.shape)
        assert jnp.allclose(o.astype(jnp.float32), r, atol=2e-2, rtol=2e-2)

    print("KERNEL_OK")
</pallas_src>

<mosaic_0001>
module attributes {stable_mosaic.version = 11 : i64} {
  func.func @_clip_kernel(%arg0: i32, %arg1: memref<32x4xbf16, #tpu.memory_space<vmem>>, %arg2: memref<32x4xbf16, #tpu.memory_space<vmem>>, %arg3: memref<32x4xbf16, #tpu.memory_space<vmem>>) attributes {dimension_semantics = [#tpu.dimension_semantics<parallel>], iteration_bounds = array<i64: 1>, scalar_prefetch = 0 : i64, scratch_operands = 0 : i64, tpu.core_type = #tpu.core_type<tc>, window_params = [{transform_indices = @transform_0, window_bounds = array<i64: 32, 4>}, {transform_indices = @transform_1, window_bounds = array<i64: 32, 4>}, {transform_indices = @transform_2, window_bounds = array<i64: 32, 4>}]} {
    %c0 = arith.constant 0 : index
    %c0_0 = arith.constant 0 : index
    %0 = vector.load %arg1[%c0, %c0_0] : memref<32x4xbf16, #tpu.memory_space<vmem>>, vector<32x4xbf16>
    %c0_1 = arith.constant 0 : index
    %c0_2 = arith.constant 0 : index
    %1 = vector.load %arg2[%c0_1, %c0_2] : memref<32x4xbf16, #tpu.memory_space<vmem>>, vector<32x4xbf16>
    %2 = arith.addf %0, %1 : vector<32x4xbf16>
    %c0_3 = arith.constant 0 : index
    %c0_4 = arith.constant 0 : index
    %3 = vector.load %arg3[%c0_3, %c0_4] : memref<32x4xbf16, #tpu.memory_space<vmem>>, vector<32x4xbf16>
    tpu.vector_store %arg3[%c0_3, %c0_4], %2 {strides = array<i32>} : memref<32x4xbf16, #tpu.memory_space<vmem>>, vector<32x4xbf16>,
    return
  }
  func.func @transform_0(%arg0: i32) -> (i32, i32) {
    %c0_i32 = arith.constant 0 : i32
    %c0_i32_0 = arith.constant 0 : i32
    return %arg0, %c0_i32 : i32, i32
  }
  func.func @transform_1(%arg0: i32) -> (i32, i32) {
    %c0_i32 = arith.constant 0 : i32
    %c0_i32_0 = arith.constant 0 : i32
    return %arg0, %c0_i32 : i32, i32
  }
  func.func @transform_2(%arg0: i32) -> (i32, i32) {
    %c0_i32 = arith.constant 0 : i32
    %c0_i32_0 = arith.constant 0 : i32
    return %arg0, %c0_i32 : i32, i32
  }
}

module attributes {stable_mosaic.version = 11 : i64} {
  func.func @_gda_kernel(%arg0: i32, %arg1: memref<4x4x32xbf16, #tpu.memory_space<vmem>>, %arg2: memref<4x1x32xbf16, #tpu.memory_space<vmem>>, %arg3: memref<4x4x4xbf16, #tpu.memory_space<vmem>>, %arg4: memref<4x4x1xbf16, #tpu.memory_space<vmem>>, %arg5: memref<4x4x32xbf16, #tpu.memory_space<vmem>>, %arg6: memref<4x4x4xbf16, #tpu.memory_space<vmem>>) attributes {dimension_semantics = [#tpu.dimension_semantics<parallel>], iteration_bounds = array<i64: 1>, scalar_prefetch = 0 : i64, scratch_operands = 0 : i64, tpu.core_type = #tpu.core_type<tc>, window_params = [{transform_indices = @transform_0, window_bounds = array<i64: 4, 4, 32>}, {transform_indices = @transform_1, window_bounds = array<i64: 4, 1, 32>}, {transform_indices = @transform_2, window_bounds = array<i64: 4, 4, 4>}, {transform_indices = @transform_3, window_bounds = array<i64: 4, 4, 1>}, {transform_indices = @transform_4, window_bounds = array<i64: 4, 4, 32>}, {transform_indices = @transform_5, window_bounds = array<i64: 4, 4, 4>}]} {
    %c0 = arith.constant 0 : index
    %c0_0 = arith.constant 0 : index
    %c0_1 = arith.constant 0 : index
    %0 = vector.load %arg1[%c0, %c0_0, %c0_1] : memref<4x4x32xbf16, #tpu.memory_space<vmem>>, vector<4x4x32xbf16>
    %c0_2 = arith.constant 0 : index
    %c0_3 = arith.constant 0 : index
    %c0_4 = arith.constant 0 : index
    %1 = vector.load %arg2[%c0_2, %c0_3, %c0_4] : memref<4x1x32xbf16, #tpu.memory_space<vmem>>, vector<4x1x32xbf16>
    %2 = vector.broadcast %1 : vector<4x1x32xbf16> to vector<4x4x32xbf16>
    %3 = arith.addf %0, %2 : vector<4x4x32xbf16>
    %c0_5 = arith.constant 0 : index
    %c0_6 = arith.constant 0 : index
    %c0_7 = arith.constant 0 : index
    %4 = vector.load %arg5[%c0_5, %c0_6, %c0_7] : memref<4x4x32xbf16, #tpu.memory_space<vmem>>, vector<4x4x32xbf16>
    tpu.vector_store %arg5[%c0_5, %c0_6, %c0_7], %3 {strides = array<i32>} : memref<4x4x32xbf16, #tpu.memory_space<vmem>>, vector<4x4x32xbf16>,
    %c0_8 = arith.constant 0 : index
    %c0_9 = arith.constant 0 : index
    %c0_10 = arith.constant 0 : index
    %5 = vector.load %arg3[%c0_8, %c0_9, %c0_10] : memref<4x4x4xbf16, #tpu.memory_space<vmem>>, vector<4x4x4xbf16>
    %c0_11 = arith.constant 0 : index
    %c0_12 = arith.constant 0 : index
    %c0_13 = arith.constant 0 : index
    %6 = vector.load %arg4[%c0_11, %c0_12, %c0_13] : memref<4x4x1xbf16, #tpu.memory_space<vmem>>, vector<4x4x1xbf16>
    %7 = vector.broadcast %6 : vector<4x4x1xbf16> to vector<4x4x4xbf16>
    %8 = arith.mulf %5, %7 : vector<4x4x4xbf16>
    %c0_14 = arith.constant 0 : index
    %c0_15 = arith.constant 0 : index
    %c0_16 = arith.constant 0 : index
    %9 = vector.load %arg6[%c0_14, %c0_15, %c0_16] : memref<4x4x4xbf16, #tpu.memory_space<vmem>>, vector<4x4x4xbf16>
    tpu.vector_store %arg6[%c0_14, %c0_15, %c0_16], %8 {strides = array<i32>} : memref<4x4x4xbf16, #tpu.memory_space<vmem>>, vector<4x4x4xbf16>,
    return
  }
  func.func @transform_0(%arg0: i32) -> (i32, i32, i32) {
    %c0_i32 = arith.constant 0 : i32
    %c0_i32_0 = arith.constant 0 : i32
    %c0_i32_1 = arith.constant 0 : i32
    return %arg0, %c0_i32, %c0_i32_0 : i32, i32, i32
  }
  func.func @transform_1(%arg0: i32) -> (i32, i32, i32) {
    %c0_i32 = arith.constant 0 : i32
    %c0_i32_0 = arith.constant 0 : i32
    %c0_i32_1 = arith.constant 0 : i32
    return %arg0, %c0_i32, %c0_i32_0 : i32, i32, i32
  }
  func.func @transform_2(%arg0: i32) -> (i32, i32, i32) {
    %c0_i32 = arith.constant 0 : i32
    %c0_i32_0 = arith.constant 0 : i32
    %c0_i32_1 = arith.constant 0 : i32
    return %arg0, %c0_i32, %c0_i32_0 : i32, i32, i32
  }
  func.func @transform_3(%arg0: i32) -> (i32, i32, i32) {
    %c0_i32 = arith.constant 0 : i32
    %c0_i32_0 = arith.constant 0 : i32
    %c0_i32_1 = arith.constant 0 : i32
    return %arg0, %c0_i32, %c0_i32_0 : i32, i32, i32
  }
  func.func @transform_4(%arg0: i32) -> (i32, i32, i32) {
    %c0_i32 = arith.constant 0 : i32
    %c0_i32_0 = arith.constant 0 : i32
    %c0_i32_1 = arith.constant 0 : i32
    return %arg0, %c0_i32, %c0_i32_0 : i32, i32, i32
  }
  func.func @transform_5(%arg0: i32) -> (i32, i32, i32) {
    %c0_i32 = arith.constant 0 : i32
    %c0_i32_0 = arith.constant 0 : i32
    %c0_i32_1 = arith.constant 0 : i32
    return %arg0, %c0_i32, %c0_i32_0 : i32, i32, i32
  }
}

</mosaic_0001>

<bundles_post_ra>
// kernel: gda_forward.3
= control target key start
LH: loop header
LB: loop body
LE: loop exit
PB: predicated region body
PF: predicated region fallthrough
CT: control target
= control target key end

     0   :  { %vm23_vm0 = vcmask 27648   ;;  %s87_s0 = inlined_call_operand.vmem [shape: bf16[32,4], index: 0, kind: input, shape index: {}]   ;;  %s88_s1 = inlined_call_operand.vmem [shape: bf16[32,4], index: 1, kind: input, shape index: {}]   ;;  %s89_s2 = inlined_call_operand.vmem [shape: bf16[32,4], index: 2, kind: output, shape index: {}]  }
   0x1   :  { %v11_v0 = vld [vmem:[%s87_s0] sm:$0xf]  ;;  %v12_v2 = vld [vmem:[%s87_s0 + $0x4] sm:$0xf]  ;;  %v13_v5 = vld [vmem:[%s87_s0 + $0x8] sm:$0xf] }
   0x2   :  { %v15_v1 = vld [vmem:[%s88_s1] sm:$0xf]  ;;  %v16_v4 = vld [vmem:[%s88_s1 + $0x4] sm:$0xf]  ;;  %v17_v6 = vld [vmem:[%s88_s1 + $0x8] sm:$0xf] }
   0x3   :  { %v19_v3 = vadd.bf16 %v15_v1, %v11_v0  ;;  %v20_v7 = vadd.bf16 %v16_v4, %v12_v2  ;;  %v21_v8 = vadd.bf16 %v17_v6, %v13_v5  ;;  %v14_v9 = vld [vmem:[%s87_s0 + $0xc] sm:$0xf] }
   0x4   :  { %v18_v10 = vld [vmem:[%s88_s1 + $0xc] sm:$0xf] }
   0x5   :  { %24 = vst.msk [vmem:[%s89_s2] sm:$0xf] %vm23_vm0, %v19_v3  ;;  %v22_v11 = vadd.bf16 %v18_v10, %v14_v9  ;;  %25 = vst.msk [vmem:[%s89_s2 + $0x4] sm:$0xf] %vm23_vm0, %v20_v7 }
   0x6   :  { %26 = vst.msk [vmem:[%s89_s2 + $0x8] sm:$0xf] %vm23_vm0, %v21_v8 }
   0x7   :  { %27 = vst.msk [vmem:[%s89_s2 + $0xc] sm:$0xf] %vm23_vm0, %v22_v11 }

// kernel: gda_forward.2
= control target key start
LH: loop header
LB: loop body
LE: loop exit
PB: predicated region body
PF: predicated region fallthrough
CT: control target
= control target key end

     0   :  { %v31_v2 = vlaneseq  ;;  %v179_v3 = vmov 0   ;;  %s277_s0 = inlined_call_operand.vmem [shape: bf16[4,4,32], index: 0, kind: input, shape index: {}]   ;;  %s278_s1 = inlined_call_operand.vmem [shape: bf16[4,1,32], index: 1, kind: input, shape index: {}]   ;;  %s279_s2 = inlined_call_operand.vmem [shape: bf16[4,4,4], index: 2, kind: input, shape index: {}]   ;;  %s280_s3 = inlined_call_operand.vmem [shape: bf16[4,4,1], index: 3, kind: input, shape index: {}]   ;;  %s281_s4 = inlined_call_operand.hbm [shape: bf16[4,4,32], index: 4, kind: output, shape index: {0}]   ;;  %s282_s5 = inlined_call_operand.vmem [shape: bf16[4,4,4], index: 5, kind: output, shape index: {1}]  }
   0x1   :  { %v71_v0 = vld [vmem:[%s280_s3 + $0x4] sm:$0x3]  ;;  %v69_v1 = vld [vmem:[%s280_s3] sm:$0x3]  ;;  %156 = vset.pattern.permute.xlu1 %v179_v3  ;;  %155 = vset.pattern.permute.xlu0 %v179_v3  ;;  %v72_v5 = vld [vmem:[%s280_s3 + $0x6] sm:$0x3] }
   0x2   :  { %99 = vperm.xlu1 %156, %v71_v0   ;;  %75 = vperm.xlu0 %155, %v69_v1   ;;  %v32_v4 = vshrl.u32 %v31_v2, 7  ;;  %v70_v6 = vld [vmem:[%s280_s3 + $0x2] sm:$0x3] }
   0x3   :  { %11 = vsyncpa [#allocation3], 0  ;;  %v24_v8 = vld [vmem:[%s278_s1] sm:$0x1]  ;;  %v25_v9 = vld [vmem:[%s278_s1 + $0x1] sm:$0x1] }
   0x4   :  { %v33_v7 = vsub.s32 0, %v32_v4  ;;  %v26_v10 = vld [vmem:[%s278_s1 + $0x2] sm:$0x1]  ;;  %v27_v11 = vld [vmem:[%s278_s1 + $0x3] sm:$0x1]  ;;  %v29_v12 = vpack.i.b16 %v24_v8, %v24_v8  ;;  %v36_v15 = vpack.i.b16 %v25_v9, %v25_v9  ;;  %s180_s1 = smov [#allocation2]  }
   0x5   :  { %v20_v13 = vld [vmem:[%s277_s0] sm:$0x3]  ;;  %v21_v14 = vld [vmem:[%s277_s0 + $0x2] sm:$0x3]  ;;  %v43_v16 = vpack.i.b16 %v26_v10, %v26_v10  ;;  %v50_v17 = vpack.i.b16 %v27_v11, %v27_v11  ;;  %v22_v18 = vld [vmem:[%s277_s0 + $0x4] sm:$0x3] }
   0x6   :  { %111 = vperm.xlu1 %156, %v72_v5   ;;  %87 = vperm.xlu0 %155, %v70_v6   ;;  %v23_v19 = vld [vmem:[%s277_s0 + $0x6] sm:$0x3]  ;;  %v34_v20 = vrot.slane %v29_v12, %v33_v7  ;;  %s135_s16 = sshll.u32 %s180_s1, 4  ;;  %v41_v21 = vrot.slane %v36_v15, %v33_v7  ;;  %vm60_vm0 = vcmask 254976   ;;  %s136_s16 = int_to_ptr.vmem [resolvable:$true] %s135_s16 }
   0x7   :  { %v48_v22 = vrot.slane %v43_v16, %v33_v7  ;;  %v55_v23 = vrot.slane %v50_v17, %v33_v7  ;;  %s157_s17 = scalar_lea.vmem %s136_s16, 128  ;;  %p162_p1 = scmp.lt.s32.totalorder %s136_s16, %s136_s16 }
   0x8   :  { %v56_v24 = vadd.bf16 %v34_v20, %v20_v13  ;;  %v57_v25 = vadd.bf16 %v41_v21, %v21_v14  ;;  %p158_p0 = scmp.ne.s32.totalorder %s136_s16, %s157_s17  ;;  %p163_p2 = scmp.lt.s32.totalorder %s157_s17, %s157_s17 }
   0x9   :  { %v58_v26 = vadd.bf16 %v48_v22, %v22_v18  ;;  %v59_v27 = vadd.bf16 %v55_v23, %v23_v19 }
   0xa   :  { %61 = vst.msk [vmem:[#allocation2] sm:$0x3] %vm60_vm0, %v56_v24  ;;  %62 = vst.msk [vmem:[#allocation2 + $0x2] sm:$0x3] %vm60_vm0, %v57_v25  ;;  %p164_p3 = por %p163_p2, %p162_p1 }
   0xb   :  { %63 = vst.msk [vmem:[#allocation2 + $0x4] sm:$0x3] %vm60_vm0, %v58_v26  ;;  %64 = vst.msk [vmem:[#allocation2 + $0x6] sm:$0x3] %vm60_vm0, %v59_v27 }
   0xc   :  { %p165_p4 = pnand %p164_p3, %p158_p0 }
   0xe   :  { %168 = shalt.err (!%p165_p4)
}
   0xf   :  { %s181_s0 = smov 32   ;;  %s182_s18 = smov 2   ;;  %v183_v28 = vmov 269488144   ;;  %v67_v33 = vld [vmem:[%s279_s2 + $0x4] sm:$0x3] }
  0x10   :  { %141 = dma.vmem_to_hbm [thread:$0]  %s136_s16, 128, %s281_s4, [#allocation3], %s181_s0, %s181_s0, %s182_s18   ;;  %v79_v29 = vunpack.c.l.s4 %v183_v28  ;;  %vm125_vm1 = vcmask 25600  }
  0x11   :  { %v65_v35 = vld [vmem:[%s279_s2] sm:$0x3]  ;;  %v68_v41 = vld [vmem:[%s279_s2 + $0x6] sm:$0x3]  ;;  %v66_v43 = vld [vmem:[%s279_s2 + $0x2] sm:$0x3] }
  0x12   :  { %v80_v30 = vunpack.c.0.s8 %v79_v29 }
  0x14   :  { %v83_v31 = vsub.s32 %v80_v30, %v32_v4 }
  0x7d   :  { %v100_v32 = vpop.permute.xlu1 %99  ;;  %v76_v34 = vpop.permute.xlu0 %75 }
  0x7e   :  { %v108_v36 = vrot.slane %v100_v32, %v83_v31  ;;  %v84_v37 = vrot.slane %v76_v34, %v83_v31 }
  0x80   :  { %v123_v38 = vmul.bf16 %v108_v36, %v67_v33  ;;  %v121_v39 = vmul.bf16 %v84_v37, %v65_v35 }
  0x81   :  { %v112_v40 = vpop.permute.xlu1 %111  ;;  %v88_v42 = vpop.permute.xlu0 %87 }
  0x82   :  { %128 = vst.msk [vmem:[%s282_s5 + $0x4] sm:$0x3] %vm125_vm1, %v123_v38  ;;  %126 = vst.msk [vmem:[%s282_s5] sm:$0x3] %vm125_vm1, %v121_v39  ;;  %v120_v44 = vrot.slane %v112_v40, %v83_v31  ;;  %v96_v45 = vrot.slane %v88_v42, %v83_v31 }
  0x84   :  { %v124_v46 = vmul.bf16 %v120_v44, %v68_v41  ;;  %v122_v47 = vmul.bf16 %v96_v45, %v66_v43 }
  0x86   :  { %129 = vst.msk [vmem:[%s282_s5 + $0x6] sm:$0x3] %vm125_vm1, %v124_v46  ;;  %127 = vst.msk [vmem:[%s282_s5 + $0x2] sm:$0x3] %vm125_vm1, %v122_v47 }
  0x87   :  { %177 = dma.done.wait [#allocation3], 128  }
  0x88   :  { %178 = vsyncadd [#allocation3], 4294967168 }
  0x89   :  { %149 = vsyncpa [#allocation3], 1 }

</bundles_post_ra>
